<compile_context>
chip_gen: v5e
topology: v5e:2x2
jax: 0.10.0
libtpu: 0.0.40
codegen_flags: <defaults>
</compile_context>

<pallas_src>
import jax
import jax.numpy as jnp
from jax.experimental import pallas as pl
from jax.experimental.pallas import tpu as pltpu


def _round_up(x, m):
    return (x + m - 1) // m * m


def _make_resblock_kernel(H, W):
    L = H * W
    taps = [(dh, dw) for dh in (-1, 0, 1) for dw in (-1, 0, 1)]

    def kernel(x_ref, masks_ref, w1_ref, b1_ref, w2_ref, b2_ref, o_ref):
        # x_ref:    (1, Ci8, L)   input image, channels on sublanes, H*W on lanes
        # masks_ref:(9, L)        per-tap validity masks (precomputed in the wrapper)
        # w1_ref:   (Cr8, 9*Ci8)  conv1 weights packed for im2col
        # b1_ref:   (Cr8, 1)
        # w2_ref:   (Ci8, 9*Cr8)  conv2 weights packed for im2col
        # b2_ref:   (Ci8, 1)
        # o_ref:    (1, Ci8, L)
        x_flat = x_ref[0].astype(jnp.float32)            # (Ci8, L), lane-dense

        def im2col(a):
            """(C, L) -> (9*C, L) patch matrix, rows ordered tap-major / channel-minor."""
            # Wrap-around shifted views via aligned doubling + static lane slices;
            # wrapped / out-of-image taps are zeroed by the precomputed masks.
            ext = jnp.concatenate([a, a], axis=1)        # (C, 2L), vreg-aligned concat
            slabs = []
            for k, (dh, dw) in enumerate(taps):
                s = dh * W + dw
                if s == 0:
                    slab = a                             # centre tap: always valid
                else:
                    off = s % L
                    slab = ext[:, off:off + L] * masks_ref[k:k + 1, :]
                slabs.append(slab)
            # C is padded to a multiple of 8 wrapper-side -> aligned sublane concat.
            return jnp.concatenate(slabs, axis=0)        # (9*C, L)

        # conv1 (3x3 'same') as ONE MXU matmul, fp32 accumulation, + bias + ReLU.
        h = jnp.dot(w1_ref[...], im2col(x_flat),
                    preferred_element_type=jnp.float32)  # (Cr8, L)
        h = jnp.maximum(h + b1_ref[...], 0.0)

        # conv2 (3x3 'same') + bias + residual add + final ReLU.
        y = jnp.dot(w2_ref[...], im2col(h),
                    preferred_element_type=jnp.float32)  # (Ci8, L)
        y = jnp.maximum(y + b2_ref[...] + x_flat, 0.0)

        o_ref[0] = y.astype(o_ref.dtype)                 # (8, 256): unmasked, lane-dense store

    return kernel


def residual_block_pallas(x_nchw, w1_oihw, b1, w2_oihw, b2):
    """x_nchw: (N, Cin, H, W) float32, PyTorch layout.  Returns (N, Cin, H, W)."""
    N, Cin, H, W = x_nchw.shape
    Cres = w1_oihw.shape[0]
    L = H * W
    Ci8 = _round_up(Cin, 8)
    Cr8 = _round_up(Cres, 8)

    # NCHW -> (N, C, H*W) is a free reshape; pad channels to a sublane multiple so
    # every in-kernel concat and the output store are tile aligned.
    x_flat = jnp.pad(x_nchw.reshape(N, Cin, L), ((0, 0), (0, Ci8 - Cin), (0, 0)))

    # Pack weights wrapper-side into dense 2-D matmul operands:
    #   wmat[co, (kh*3 + kw)*Cpad + ci] = w[co, ci, kh, kw]
    w1p = jnp.pad(w1_oihw, ((0, Cr8 - Cres), (0, Ci8 - Cin), (0, 0), (0, 0)))
    w2p = jnp.pad(w2_oihw, ((0, Ci8 - Cin), (0, Cr8 - Cres), (0, 0), (0, 0)))
    w1mat = jnp.transpose(w1p, (0, 2, 3, 1)).reshape(Cr8, 9 * Ci8)
    w2mat = jnp.transpose(w2p, (0, 2, 3, 1)).reshape(Ci8, 9 * Cr8)
    b1c = jnp.pad(b1, (0, Cr8 - Cres)).reshape(Cr8, 1)
    b2c = jnp.pad(b2, (0, Ci8 - Cin)).reshape(Ci8, 1)

    # Per-tap validity masks over the flattened image (zero out-of-image / row-wrapped taps).
    p = jnp.arange(L, dtype=jnp.int32)
    yy, xx = p // W, p % W
    masks = jnp.stack(
        [((yy + dh >= 0) & (yy + dh < H) & (xx + dw >= 0) & (xx + dw < W)
          ).astype(jnp.float32)
         for dh in (-1, 0, 1) for dw in (-1, 0, 1)],
        axis=0)                                          # (9, L)

    kernel = _make_resblock_kernel(H, W)
    out_flat = pl.pallas_call(
        kernel,
        out_shape=jax.ShapeDtypeStruct((N, Ci8, L), x_nchw.dtype),
        grid_spec=pltpu.PrefetchScalarGridSpec(
            num_scalar_prefetch=0,
            grid=(N,),
            in_specs=[
                pl.BlockSpec((1, Ci8, L), lambda n: (n, 0, 0)),
                pl.BlockSpec((9, L), lambda n: (0, 0)),
                pl.BlockSpec((Cr8, 9 * Ci8), lambda n: (0, 0)),
                pl.BlockSpec((Cr8, 1), lambda n: (0, 0)),
                pl.BlockSpec((Ci8, 9 * Cr8), lambda n: (0, 0)),
                pl.BlockSpec((Ci8, 1), lambda n: (0, 0)),
            ],
            out_specs=pl.BlockSpec((1, Ci8, L), lambda n: (n, 0, 0)),
        ),
        compiler_params=pltpu.CompilerParams(
            dimension_semantics=("parallel",)),
    )(x_flat, masks, w1mat, b1c, w2mat, b2c)

    return out_flat[:, :Cin, :].reshape(N, Cin, H, W)


def residual_block_ref(x, w1, b1, w2, b2):
    """Pure-JAX reference matching the PyTorch module (NCHW / OIHW)."""
    dn1 = jax.lax.conv_dimension_numbers(x.shape, w1.shape, ('NCHW', 'OIHW', 'NCHW'))
    h = jax.lax.conv_general_dilated(x, w1, (1, 1), 'SAME', dimension_numbers=dn1,
                                     precision=jax.lax.Precision.HIGHEST)
    h = jax.nn.relu(h + b1.reshape(1, -1, 1, 1))
    dn2 = jax.lax.conv_dimension_numbers(h.shape, w2.shape, ('NCHW', 'OIHW', 'NCHW'))
    y = jax.lax.conv_general_dilated(h, w2, (1, 1), 'SAME', dimension_numbers=dn2,
                                     precision=jax.lax.Precision.HIGHEST)
    y = y + b2.reshape(1, -1, 1, 1) + x
    return jax.nn.relu(y)


if __name__ == "__main__":
    # Small shapes: batch=2, x_channels=4, residual_channels=8, spatial=16x16.
    N, Cx, Cr, H, W = 2, 4, 8, 16, 16

    key = jax.random.PRNGKey(0)
    k_x, k_w1, k_b1, k_w2, k_b2 = jax.random.split(key, 5)

    x_nchw = jax.random.normal(k_x, (N, Cx, H, W), dtype=jnp.float32)
    w1_oihw = 0.1 * jax.random.normal(k_w1, (Cr, Cx, 3, 3), dtype=jnp.float32)
    b1 = 0.1 * jax.random.normal(k_b1, (Cr,), dtype=jnp.float32)
    w2_oihw = 0.1 * jax.random.normal(k_w2, (Cx, Cr, 3, 3), dtype=jnp.float32)
    b2 = 0.1 * jax.random.normal(k_b2, (Cx,), dtype=jnp.float32)

    out = residual_block_pallas(x_nchw, w1_oihw, b1, w2_oihw, b2)
    out = jax.block_until_ready(out)
    assert out.shape == (N, Cx, H, W)

    ref = residual_block_ref(x_nchw, w1_oihw, b1, w2_oihw, b2)
    max_err = float(jnp.max(jnp.abs(out - ref)))
    assert max_err < 1e-4, f"mismatch vs reference: {max_err}"

    print("KERNEL_OK")
</pallas_src>

<mosaic_0001>
module attributes {stable_mosaic.version = 11 : i64} {
  func.func @kernel(%arg0: i32, %arg1: memref<1x8x256xf32, #tpu.memory_space<vmem>>, %arg2: memref<9x256xf32, #tpu.memory_space<vmem>>, %arg3: memref<8x72xf32, #tpu.memory_space<vmem>>, %arg4: memref<8x1xf32, #tpu.memory_space<vmem>>, %arg5: memref<8x72xf32, #tpu.memory_space<vmem>>, %arg6: memref<8x1xf32, #tpu.memory_space<vmem>>, %arg7: memref<1x8x256xf32, #tpu.memory_space<vmem>>) attributes {dimension_semantics = [#tpu.dimension_semantics<parallel>], iteration_bounds = array<i64: 2>, scalar_prefetch = 0 : i64, scratch_operands = 0 : i64, tpu.core_type = #tpu.core_type<tc>, window_params = [{transform_indices = @transform_0, window_bounds = array<i64: 1, 8, 256>}, {pipeline_mode = #tpu.pipeline_mode<synchronous>, transform_indices = @transform_1, window_bounds = array<i64: 9, 256>}, {pipeline_mode = #tpu.pipeline_mode<synchronous>, transform_indices = @transform_2, window_bounds = array<i64: 8, 72>}, {pipeline_mode = #tpu.pipeline_mode<synchronous>, transform_indices = @transform_3, window_bounds = array<i64: 8, 1>}, {pipeline_mode = #tpu.pipeline_mode<synchronous>, transform_indices = @transform_4, window_bounds = array<i64: 8, 72>}, {pipeline_mode = #tpu.pipeline_mode<synchronous>, transform_indices = @transform_5, window_bounds = array<i64: 8, 1>}, {transform_indices = @transform_6, window_bounds = array<i64: 1, 8, 256>}]} {
    %c0 = arith.constant 0 : index
    %c0_0 = arith.constant 0 : index
    %c0_1 = arith.constant 0 : index
    %0 = vector.load %arg1[%c0, %c0_0, %c0_1] : memref<1x8x256xf32, #tpu.memory_space<vmem>>, vector<1x8x256xf32>
    %1 = vector.shape_cast %0 : vector<1x8x256xf32> to vector<8x256xf32>
    %c0_2 = arith.constant 0 : index
    %c0_3 = arith.constant 0 : index
    %2 = vector.load %arg3[%c0_2, %c0_3] : memref<8x72xf32, #tpu.memory_space<vmem>>, vector<8x72xf32>
    %3 = tpu.concatenate %1, %1 in 1 : vector<8x256xf32>, vector<8x256xf32> -> vector<8x512xf32>
    %4 = vector.extract_strided_slice %3 {offsets = [0, 239], sizes = [8, 256], strides = [1, 1]} : vector<8x512xf32> to vector<8x256xf32>
    %c0_4 = arith.constant 0 : index
    %c0_5 = arith.constant 0 : index
    %5 = vector.load %arg2[%c0_4, %c0_5] : memref<9x256xf32, #tpu.memory_space<vmem>>, vector<1x256xf32>
    %6 = vector.broadcast %5 : vector<1x256xf32> to vector<8x256xf32>
    %7 = arith.mulf %4, %6 : vector<8x256xf32>
    %8 = vector.extract_strided_slice %3 {offsets = [0, 240], sizes = [8, 256], strides = [1, 1]} : vector<8x512xf32> to vector<8x256xf32>
    %c1 = arith.constant 1 : index
    %c0_6 = arith.constant 0 : index
    %9 = vector.load %arg2[%c1, %c0_6] : memref<9x256xf32, #tpu.memory_space<vmem>>, vector<1x256xf32>
    %10 = vector.broadcast %9 : vector<1x256xf32> to vector<8x256xf32>
    %11 = arith.mulf %8, %10 : vector<8x256xf32>
    %12 = vector.extract_strided_slice %3 {offsets = [0, 241], sizes = [8, 256], strides = [1, 1]} : vector<8x512xf32> to vector<8x256xf32>
    %c2 = arith.constant 2 : index
    %c0_7 = arith.constant 0 : index
    %13 = vector.load %arg2[%c2, %c0_7] : memref<9x256xf32, #tpu.memory_space<vmem>>, vector<1x256xf32>
    %14 = vector.broadcast %13 : vector<1x256xf32> to vector<8x256xf32>
    %15 = arith.mulf %12, %14 : vector<8x256xf32>
    %16 = vector.extract_strided_slice %3 {offsets = [0, 255], sizes = [8, 256], strides = [1, 1]} : vector<8x512xf32> to vector<8x256xf32>
    %c3 = arith.constant 3 : index
    %c0_8 = arith.constant 0 : index
    %17 = vector.load %arg2[%c3, %c0_8] : memref<9x256xf32, #tpu.memory_space<vmem>>, vector<1x256xf32>
    %18 = vector.broadcast %17 : vector<1x256xf32> to vector<8x256xf32>
    %19 = arith.mulf %16, %18 : vector<8x256xf32>
    %20 = vector.extract_strided_slice %3 {offsets = [0, 1], sizes = [8, 256], strides = [1, 1]} : vector<8x512xf32> to vector<8x256xf32>
    %c5 = arith.constant 5 : index
    %c0_9 = arith.constant 0 : index
    %21 = vector.load %arg2[%c5, %c0_9] : memref<9x256xf32, #tpu.memory_space<vmem>>, vector<1x256xf32>
    %22 = vector.broadcast %21 : vector<1x256xf32> to vector<8x256xf32>
    %23 = arith.mulf %20, %22 : vector<8x256xf32>
    %24 = vector.extract_strided_slice %3 {offsets = [0, 15], sizes = [8, 256], strides = [1, 1]} : vector<8x512xf32> to vector<8x256xf32>
    %c6 = arith.constant 6 : index
    %c0_10 = arith.constant 0 : index
    %25 = vector.load %arg2[%c6, %c0_10] : memref<9x256xf32, #tpu.memory_space<vmem>>, vector<1x256xf32>
    %26 = vector.broadcast %25 : vector<1x256xf32> to vector<8x256xf32>
    %27 = arith.mulf %24, %26 : vector<8x256xf32>
    %28 = vector.extract_strided_slice %3 {offsets = [0, 16], sizes = [8, 256], strides = [1, 1]} : vector<8x512xf32> to vector<8x256xf32>
    %c7 = arith.constant 7 : index
    %c0_11 = arith.constant 0 : index
    %29 = vector.load %arg2[%c7, %c0_11] : memref<9x256xf32, #tpu.memory_space<vmem>>, vector<1x256xf32>
    %30 = vector.broadcast %29 : vector<1x256xf32> to vector<8x256xf32>
    %31 = arith.mulf %28, %30 : vector<8x256xf32>
    %32 = vector.extract_strided_slice %3 {offsets = [0, 17], sizes = [8, 256], strides = [1, 1]} : vector<8x512xf32> to vector<8x256xf32>
    %c8 = arith.constant 8 : index
    %c0_12 = arith.constant 0 : index
    %33 = vector.load %arg2[%c8, %c0_12] : memref<9x256xf32, #tpu.memory_space<vmem>>, vector<1x256xf32>
    %34 = vector.broadcast %33 : vector<1x256xf32> to vector<8x256xf32>
    %35 = arith.mulf %32, %34 : vector<8x256xf32>
    %36 = tpu.concatenate %7, %11, %15, %19, %1, %23, %27, %31, %35 in 0 : vector<8x256xf32>, vector<8x256xf32>, vector<8x256xf32>, vector<8x256xf32>, vector<8x256xf32>, vector<8x256xf32>, vector<8x256xf32>, vector<8x256xf32>, vector<8x256xf32> -> vector<72x256xf32>
    %cst = arith.constant dense<0.000000e+00> : vector<8x256xf32>
    %37 = tpu.matmul %2, %36, %cst {dimension_numbers = #tpu.dot_dimension_numbers<[1], [0], [0], [1], [0, 0, 1, 1], [], []>} : vector<8x72xf32>, vector<72x256xf32>, vector<8x256xf32> -> vector<8x256xf32>
    %c0_13 = arith.constant 0 : index
    %c0_14 = arith.constant 0 : index
    %38 = vector.load %arg4[%c0_13, %c0_14] : memref<8x1xf32, #tpu.memory_space<vmem>>, vector<8x1xf32>
    %39 = vector.broadcast %38 : vector<8x1xf32> to vector<8x256xf32>
    %40 = arith.addf %37, %39 : vector<8x256xf32>
    %cst_15 = arith.constant 0.000000e+00 : f32
    %41 = vector.broadcast %cst_15 : f32 to vector<8x256xf32>
    %42 = arith.maximumf %40, %41 : vector<8x256xf32>
    %c0_16 = arith.constant 0 : index
    %c0_17 = arith.constant 0 : index
    %43 = vector.load %arg5[%c0_16, %c0_17] : memref<8x72xf32, #tpu.memory_space<vmem>>, vector<8x72xf32>
    %44 = tpu.concatenate %42, %42 in 1 : vector<8x256xf32>, vector<8x256xf32> -> vector<8x512xf32>
    %45 = vector.extract_strided_slice %44 {offsets = [0, 239], sizes = [8, 256], strides = [1, 1]} : vector<8x512xf32> to vector<8x256xf32>
    %c0_18 = arith.constant 0 : index
    %c0_19 = arith.constant 0 : index
    %46 = vector.load %arg2[%c0_18, %c0_19] : memref<9x256xf32, #tpu.memory_space<vmem>>, vector<1x256xf32>
    %47 = vector.broadcast %46 : vector<1x256xf32> to vector<8x256xf32>
    %48 = arith.mulf %45, %47 : vector<8x256xf32>
    %49 = vector.extract_strided_slice %44 {offsets = [0, 240], sizes = [8, 256], strides = [1, 1]} : vector<8x512xf32> to vector<8x256xf32>
    %c1_20 = arith.constant 1 : index
    %c0_21 = arith.constant 0 : index
    %50 = vector.load %arg2[%c1_20, %c0_21] : memref<9x256xf32, #tpu.memory_space<vmem>>, vector<1x256xf32>
    %51 = vector.broadcast %50 : vector<1x256xf32> to vector<8x256xf32>
    %52 = arith.mulf %49, %51 : vector<8x256xf32>
    %53 = vector.extract_strided_slice %44 {offsets = [0, 241], sizes = [8, 256], strides = [1, 1]} : vector<8x512xf32> to vector<8x256xf32>
    %c2_22 = arith.constant 2 : index
    %c0_23 = arith.constant 0 : index
    %54 = vector.load %arg2[%c2_22, %c0_23] : memref<9x256xf32, #tpu.memory_space<vmem>>, vector<1x256xf32>
    %55 = vector.broadcast %54 : vector<1x256xf32> to vector<8x256xf32>
    %56 = arith.mulf %53, %55 : vector<8x256xf32>
    %57 = vector.extract_strided_slice %44 {offsets = [0, 255], sizes = [8, 256], strides = [1, 1]} : vector<8x512xf32> to vector<8x256xf32>
    %c3_24 = arith.constant 3 : index
    %c0_25 = arith.constant 0 : index
    %58 = vector.load %arg2[%c3_24, %c0_25] : memref<9x256xf32, #tpu.memory_space<vmem>>, vector<1x256xf32>
    %59 = vector.broadcast %58 : vector<1x256xf32> to vector<8x256xf32>
    %60 = arith.mulf %57, %59 : vector<8x256xf32>
    %61 = vector.extract_strided_slice %44 {offsets = [0, 1], sizes = [8, 256], strides = [1, 1]} : vector<8x512xf32> to vector<8x256xf32>
    %c5_26 = arith.constant 5 : index
    %c0_27 = arith.constant 0 : index
    %62 = vector.load %arg2[%c5_26, %c0_27] : memref<9x256xf32, #tpu.memory_space<vmem>>, vector<1x256xf32>
    %63 = vector.broadcast %62 : vector<1x256xf32> to vector<8x256xf32>
    %64 = arith.mulf %61, %63 : vector<8x256xf32>
    %65 = vector.extract_strided_slice %44 {offsets = [0, 15], sizes = [8, 256], strides = [1, 1]} : vector<8x512xf32> to vector<8x256xf32>
    %c6_28 = arith.constant 6 : index
    %c0_29 = arith.constant 0 : index
    %66 = vector.load %arg2[%c6_28, %c0_29] : memref<9x256xf32, #tpu.memory_space<vmem>>, vector<1x256xf32>
    %67 = vector.broadcast %66 : vector<1x256xf32> to vector<8x256xf32>
    %68 = arith.mulf %65, %67 : vector<8x256xf32>
    %69 = vector.extract_strided_slice %44 {offsets = [0, 16], sizes = [8, 256], strides = [1, 1]} : vector<8x512xf32> to vector<8x256xf32>
    %c7_30 = arith.constant 7 : index
    %c0_31 = arith.constant 0 : index
    %70 = vector.load %arg2[%c7_30, %c0_31] : memref<9x256xf32, #tpu.memory_space<vmem>>, vector<1x256xf32>
    %71 = vector.broadcast %70 : vector<1x256xf32> to vector<8x256xf32>
    %72 = arith.mulf %69, %71 : vector<8x256xf32>
    %73 = vector.extract_strided_slice %44 {offsets = [0, 17], sizes = [8, 256], strides = [1, 1]} : vector<8x512xf32> to vector<8x256xf32>
    %c8_32 = arith.constant 8 : index
    %c0_33 = arith.constant 0 : index
    %74 = vector.load %arg2[%c8_32, %c0_33] : memref<9x256xf32, #tpu.memory_space<vmem>>, vector<1x256xf32>
    %75 = vector.broadcast %74 : vector<1x256xf32> to vector<8x256xf32>
    %76 = arith.mulf %73, %75 : vector<8x256xf32>
    %77 = tpu.concatenate %48, %52, %56, %60, %42, %64, %68, %72, %76 in 0 : vector<8x256xf32>, vector<8x256xf32>, vector<8x256xf32>, vector<8x256xf32>, vector<8x256xf32>, vector<8x256xf32>, vector<8x256xf32>, vector<8x256xf32>, vector<8x256xf32> -> vector<72x256xf32>
    %cst_34 = arith.constant dense<0.000000e+00> : vector<8x256xf32>
    %78 = tpu.matmul %43, %77, %cst_34 {dimension_numbers = #tpu.dot_dimension_numbers<[1], [0], [0], [1], [0, 0, 1, 1], [], []>} : vector<8x72xf32>, vector<72x256xf32>, vector<8x256xf32> -> vector<8x256xf32>
    %c0_35 = arith.constant 0 : index
    %c0_36 = arith.constant 0 : index
    %79 = vector.load %arg6[%c0_35, %c0_36] : memref<8x1xf32, #tpu.memory_space<vmem>>, vector<8x1xf32>
    %80 = vector.broadcast %79 : vector<8x1xf32> to vector<8x256xf32>
    %81 = arith.addf %78, %80 : vector<8x256xf32>
    %82 = arith.addf %81, %1 : vector<8x256xf32>
    %cst_37 = arith.constant 0.000000e+00 : f32
    %83 = vector.broadcast %cst_37 : f32 to vector<8x256xf32>
    %84 = arith.maximumf %82, %83 : vector<8x256xf32>
    %c0_38 = arith.constant 0 : index
    %c0_39 = arith.constant 0 : index
    %c0_40 = arith.constant 0 : index
    %85 = vector.load %arg7[%c0_38, %c0_39, %c0_40] : memref<1x8x256xf32, #tpu.memory_space<vmem>>, vector<1x8x256xf32>
    %86 = vector.shape_cast %85 : vector<1x8x256xf32> to vector<8x256xf32>
    %87 = vector.shape_cast %84 : vector<8x256xf32> to vector<1x8x256xf32>
    tpu.vector_store %arg7[%c0_38, %c0_39, %c0_40], %87 {strides = array<i32>} : memref<1x8x256xf32, #tpu.memory_space<vmem>>, vector<1x8x256xf32>,
    return
  }
  func.func @transform_0(%arg0: i32) -> (i32, i32, i32) {
    %c0_i32 = arith.constant 0 : i32
    %c0_i32_0 = arith.constant 0 : i32
    %c0_i32_1 = arith.constant 0 : i32
    return %arg0, %c0_i32, %c0_i32_0 : i32, i32, i32
  }
  func.func @transform_1(%arg0: i32) -> (i32, i32) {
    %c0_i32 = arith.constant 0 : i32
    %c0_i32_0 = arith.constant 0 : i32
    %c0_i32_1 = arith.constant 0 : i32
    return %c0_i32, %c0_i32_0 : i32, i32
  }
  func.func @transform_2(%arg0: i32) -> (i32, i32) {
    %c0_i32 = arith.constant 0 : i32
    %c0_i32_0 = arith.constant 0 : i32
    %c0_i32_1 = arith.constant 0 : i32
    return %c0_i32, %c0_i32_0 : i32, i32
  }
  func.func @transform_3(%arg0: i32) -> (i32, i32) {
    %c0_i32 = arith.constant 0 : i32
    %c0_i32_0 = arith.constant 0 : i32
    %c0_i32_1 = arith.constant 0 : i32
    return %c0_i32, %c0_i32_0 : i32, i32
  }
  func.func @transform_4(%arg0: i32) -> (i32, i32) {
    %c0_i32 = arith.constant 0 : i32
    %c0_i32_0 = arith.constant 0 : i32
    %c0_i32_1 = arith.constant 0 : i32
    return %c0_i32, %c0_i32_0 : i32, i32
  }
  func.func @transform_5(%arg0: i32) -> (i32, i32) {
    %c0_i32 = arith.constant 0 : i32
    %c0_i32_0 = arith.constant 0 : i32
    %c0_i32_1 = arith.constant 0 : i32
    return %c0_i32, %c0_i32_0 : i32, i32
  }
  func.func @transform_6(%arg0: i32) -> (i32, i32, i32) {
    %c0_i32 = arith.constant 0 : i32
    %c0_i32_0 = arith.constant 0 : i32
    %c0_i32_1 = arith.constant 0 : i32
    return %arg0, %c0_i32, %c0_i32_0 : i32, i32, i32
  }
}

</mosaic_0001>

<bundles_post_ra>
// kernel: tpu_custom_call.1
= control target key start
LH: loop header
LB: loop body
LE: loop exit
PB: predicated region body
PF: predicated region fallthrough
CT: control target
= control target key end

     0   :  { %11 = vsyncpa [#allocation3], 0  ;;  %s1980_s0 = inlined_call_operand.hbm [shape: f32[2,8,256], index: 0, kind: input, shape index: {}]   ;;  %s1981_s1 = inlined_call_operand.hbm [shape: f32[9,256], index: 1, kind: input, shape index: {}]   ;;  %s1982_s2 = inlined_call_operand.vmem [shape: f32[8,72], index: 2, kind: input, shape index: {}]   ;;  %s1983_s3 = inlined_call_operand.vmem [shape: f32[8,1], index: 3, kind: input, shape index: {}]   ;;  %s1984_s4 = inlined_call_operand.vmem [shape: f32[8,72], index: 4, kind: input, shape index: {}]   ;;  %s1985_s5 = inlined_call_operand.vmem [shape: f32[8,1], index: 5, kind: input, shape index: {}]   ;;  %s1986_s6 = inlined_call_operand.hbm [shape: f32[2,8,256], index: 6, kind: output, shape index: {}]  }
   0x1   :  { %13 = vsyncpa [#allocation3 + $0x1], 0 }
   0x2   :  { %14 = vsyncpa [#allocation6], 0 }
   0x3   :  { %15 = vsyncpa [#allocation4], 0 }
   0x4   :  { %17 = vsyncpa [#allocation4 + $0x1], 0  ;;  %s1504_s21 = smov 0   ;;  %s1506_s22 = smov 0  }
   0x5   :  { %s1508_s23 = smov 0   ;;  %s1510_s24 = smov 0  }
   0x6 LB: > { %s196_s27 = sshll.u32 %s1981_s1, 4  ;;  %s1528_s28 = sadd.s32 4294967295, %s1450_s24   ;;  %s1450_s24 = sphi %s1510_s24, %s1996_s24   ;;  %s1446_s23 = sphi %s1508_s23, %s1995_s23   ;;  %s1442_s22 = sphi %s1506_s22, %s1994_s22   ;;  %s1438_s21 = sphi %s1504_s21, %s1993_s21   ;;  %s197_s27 = int_to_ptr.hbm [resolvable:$true] %s196_s27 }
   0x7   : > { %p1014_p0 = scmp.ge.s32.totalorder %s1450_s24, 1  ;;  %p44_p1 = scmp.eq.s32.totalorder %s1528_s28, 0 }
   0x8   : > { %p185_p2 = scmp.lt.s32.totalorder %s1450_s24, 3  ;;  %s1452_s30 = smov [#allocation5]  }
   0x9   : > { %s198_s7 = sshll.u32 %s1452_s30, 4  ;;  %s1453_s8 = smov 256   ;;  %s199_s7 = int_to_ptr.vmem [resolvable:$true] %s198_s7 }
   0xa   : > { %p1533_p3 = pnand %p1014_p0, %p185_p2  ;;  %s1454_s9 = smov 16  }
   0xb   : > { %s1013_s10 = sadd.s32 4294967294, %s1450_s24   ;;  %s1544_s11 = sadd.s32 1, %s1450_s24  }
   0xc   : > { %p1043_p4 = pneg %p1533_p3  ;;  %s30_s12 = sadd.s32 1, %s1446_s23 }
   0xd   : > { %s27_s13 = ssub.s32 %s1450_s24, %s1544_s11  ;;  %p37_p7 = scmp.ne.s32.totalorder %s1446_s23, %s1442_s22 }
   0xe   : > { %p1044_p6 = pnand %p1043_p4, %p44_p1  ;;  %p28_p8 = scmp.eq.s32.totalorder %s27_s13, 0 }
   0xf   : > { %p38_p9 = scmp.eq.s32.totalorder %s1450_s24, 0  ;;  %p43_p10 = scmp.ne.s32.totalorder %s1442_s22, %s1438_s21 }
  0x10   : > { %1046 = dma.hbm_to_vmem [thread:$0]  (!%p1044_p6), %s197_s27, 512, %s199_s7, [#allocation6], %s1453_s8, %s1453_s8, %s1454_s9  }
  0x11   : > { %p172_p11 = scmp.eq.s32.totalorder %s1528_s28, 1  ;;  %p1560_p12 = por %p44_p1, %p43_p10 }
  0x12   : > { %s1556_s14 = scalar_select %p28_p8, %s1446_s23, %s30_s12  }
  0x13   : > { %p1564_p13 = por %p172_p11, %p37_p7  ;;  %p178_p0 = scmp.eq.s32.totalorder %s1013_s10, 1 }
  0x14   : > { %p39_p2 = por %p38_p9, %p37_p7  ;;  %s224_s17 = sand.u32 1, %s1446_s23  }
  0x15   : > { %p1569_p4 = por %p178_p0, %p43_p10  ;;  %p1056_p6 = scmp.lt.s32.totalorder %s1450_s24, 2 }
  0x16   : > { %s1017_s19 = sshll.u32 %s224_s17, 4  ;;  %s1033_s20 = sshll.u32 %s1450_s24, 4 }
  0x17   : > { %s233_s27 = scalar_lea.hbm %s1980_s0, %s1033_s20  ;;  %s228_s7 = scalar_lea.vmem [#allocation2], %s1017_s19 }
  0x18   : > { %s235_s30 = sshll.u32 %s233_s27, 4  ;;  %s237_s8 = sshll.u32 %s228_s7, 4  ;;  %s236_s30 = int_to_ptr.hbm [resolvable:$true] %s235_s30  ;;  %s238_s8 = int_to_ptr.vmem [resolvable:$true] %s237_s8 }
  0x19   : > { %p1578_p8 = pnand %p1056_p6, %p39_p2  ;;  %s225_s10 = scalar_lea.sflag [#allocation3], %s224_s17 }
  0x1a   : > { %s1350_s12 = sshra.s32 %s236_s30, 4  ;;  %s1357_s19 = scalar_lea.hbm %s1980_s0, 32  ;;  %s1351_s12 = int_to_ptr.hbm [resolvable:$true] %s1350_s12 }
  0x1b   : > { %s1352_s13 = scalar_lea.hbm %s1351_s12, 16  ;;  %p1354_p9 = pneg %p1578_p8 }
  0x1c   : > { %p1353_p7 = scmp.ne.s32.totalorder %s1351_s12, %s1352_s13  ;;  %p1358_p0 = scmp.lt.s32.totalorder %s1351_s12, %s1980_s0 }
  0x1d   : > { %p1359_p2 = scmp.lt.s32.totalorder %s1357_s19, %s1352_s13 }
  0x1e   : > { %p1355_p10 = pnand %p1354_p9, %p1353_p7 }
  0x1f   : > { %p1360_p6 = por %p1359_p2, %p1358_p0 }
  0x20   : > { %p1356_p11 = pneg %p1355_p10 }
  0x22   : > { %p1361_p5 = pnand %p1360_p6, %p1356_p11 }
  0x24   : > { %1364 = shalt.err (!%p1361_p5)
}
  0x25   : > { %1050 = dma.hbm_to_vmem [thread:$0]  (!%p1578_p8), %s236_s30, 256, %s238_s8, %s225_s10  }
  0x26   : > { %246 = sbr.rel (%p1533_p3) target bundleno = 1011 (0x3f3), region = 44  ;;  %s1595_s17 = sand.u32 (!%p1533_p3), 1, %s1442_s22  }
  0x27   : > { %s1021_s7 = sshll.u32 (!%p1533_p3), %s1595_s17, 4  ;;  %s249_s20 = scalar_lea.sflag (!%p1533_p3), [#allocation3], %s1595_s17 }
  0x28   : > { %s1601_s12 = scalar_lea.vmem (!%p1533_p3), [#allocation2], %s1021_s7 }
  0x2b   : > { %1425 = dma.done.wait (%p1560_p12), %s249_s20, 256  }
  0x2c   : > { %1427 = vsyncadd (%p1560_p12), %s249_s20, 4294967040 }
  0x2d   : > { %1429 = dma.done.wait (%p44_p1), [#allocation6], 512  }
  0x2e   : > { %1431 = vsyncadd (%p44_p1), [#allocation6], 4294966784  ;;  %v409_v0 = vld [vmem:[#allocation5 + $0x10] ss:$8 sm:$0x3]  ;;  %s1455_s29 = smov 17  }
  0x2f   : > { %v392_v1 = vld [vmem:[#allocation5 + $0x7] ss:$8 sm:$0x3]  ;;  %v411_v2 = vperm.slane %v409_v0, 0  ;;  %s1456_s30 = smov 16   ;;  %s1457_s8 = smov 15  }
  0x30   : > { %v394_v3 = vperm.slane %v392_v1, 0  ;;  %v375_v4 = vld [vmem:[#allocation5 + $0x6] ss:$8 sm:$0x3]  ;;  %v412_v6 = vperm.slane %v409_v0, 1  ;;  %v395_v7 = vperm.slane %v392_v1, 1 }
  0x31   : > { %413 = vrot.lane.b32.xlu0 %v411_v2, %s1455_s29  ;;  %v377_v5 = vperm.slane %v375_v4, 0  ;;  %v378_v8 = vperm.slane %v375_v4, 1  ;;  %v358_v9 = vld [vmem:[#allocation5 + $0x5] ss:$8 sm:$0x3]  ;;  %s1458_s15 = smov 1  }
  0x32   : > { %396 = vrot.lane.b32.xlu1 %v394_v3, %s1456_s30  ;;  %v361_v10 = vperm.slane %v358_v9, 1  ;;  %v360_v11 = vperm.slane %v358_v9, 0  ;;  %v341_v12 = vld [vmem:[#allocation5 + $0x3] ss:$8 sm:$0x3]  ;;  %s1459_s9 = smov 127  }
  0x33   : > { %379 = vrot.lane.b32.xlu2 %v377_v5, %s1457_s8  ;;  %v343_v13 = vperm.slane %v341_v12, 0  ;;  %v324_v14 = vld [vmem:[#allocation5 + $0x2] ss:$8 sm:$0x3]  ;;  %v344_v15 = vperm.slane %v341_v12, 1  ;;  %s1460_s10 = smov 113  }
  0x34   : > { %v326_v16 = vperm.slane %v324_v14, 0  ;;  %v327_v17 = vperm.slane %v324_v14, 1  ;;  %v307_v18 = vld [vmem:[#allocation5 + $0x1] ss:$8 sm:$0x3]  ;;  %s1461_s13 = smov 112  }
  0x35   : > { %v310_v19 = vperm.slane %v307_v18, 1  ;;  %v309_v20 = vperm.slane %v307_v18, 0  ;;  %v1618_v21 = vld [vmem:[%s1601_s12] sm:$0xff]  ;;  %v1621_v22 = vld [vmem:[%s1601_s12 + $0x8] sm:$0xff]  ;;  %s1462_s25 = smov 111   ;;  %s1463_s19 = smov 96  }
  0x36   : > { %v1108_v23 = vpack.i.bf16 %v1621_v22, %v1618_v21  ;;  %vm400_vm0 = vcmask 130048   ;;  %s1464_s26 = smov 94   ;;  %s1465_s27 = smov 95   ;;  %vm417_vm1 = vcmask 138240   ;;  %vm332_vm2 = vcmask 924672  }
  0x37   : > { %s1466_s20 = smov 126   ;;  %s1467_s12 = smov 110   ;;  %vm383_vm3 = vcmask 121856   ;;  %vm366_vm4 = vcmask 7168   ;;  %vm349_vm5 = vcmask 1039360   ;;  %vm315_vm6 = vcmask 916480  }
  0x38   : > { %v290_v60 = vld [vmem:[#allocation5] ss:$8 sm:$0x3]  ;;  %vm298_vm7 = vcmask 908288   ;;  %vm511_vm8 = vcmask 769024   ;;  %vm499_vm9 = vcmask 777216  }
  0x39   : > { %415 = vrot.lane.b32.xlu0 %v412_v6, %s1455_s29  ;;  %v293_v0 = vperm.slane %v290_v60, 1  ;;  %v292_v5 = vperm.slane %v290_v60, 0  ;;  %vm475_vm10 = vcmask 900096   ;;  %vm487_vm11 = vcmask 785408  }
  0x3a   : > { %398 = vrot.lane.b32.xlu1 %v395_v7, %s1456_s30  ;;  %vm445_vm12 = vcmask 1031168   ;;  %vm613_vm13 = vcmask 588800  }
  0x3b   : > { %381 = vrot.lane.b32.xlu2 %v378_v8, %s1457_s8 }
  0x41   : > { %362 = vrot.lane.b32.xlu0 %v360_v11, %s1458_s15 }
  0x42   : > { %364 = vrot.lane.b32.xlu1 %v361_v10, %s1458_s15 }
  0x43   : > { %345 = vrot.lane.b32.xlu2 %v343_v13, %s1459_s9 }
  0x49   : > { %347 = vrot.lane.b32.xlu0 %v344_v15, %s1459_s9 }
  0x4a   : > { %328 = vrot.lane.b32.xlu1 %v326_v16, %s1460_s10 }
  0x4b   : > { %330 = vrot.lane.b32.xlu2 %v327_v17, %s1460_s10 }
  0x51   : > { %311 = vrot.lane.b32.xlu0 %v309_v20, %s1461_s13 }
  0x52   : > { %313 = vrot.lane.b32.xlu1 %v310_v19, %s1461_s13 }
  0x5a   : > { %1109 = vrot.lane.b32.xlu1 %v1108_v23, %s1462_s25 }
  0x8d   : > { %v1626_v24 = vpop.permute.xlu2 %379 }
  0x8e   : > { %v388_v56 = vmul.f32 %v1626_v24, %v1618_v21 }
  0x95   : > { %v1628_v25 = vpop.permute.xlu2 %381 }
  0x96   : > { %v390_v26 = vmul.f32 %v1628_v25, %v1618_v21  ;;  %v1693_v52 = vsel %vm383_vm3, %v1626_v24, %v1628_v25 }
  0x97   : > { %v389_v57 = vmul.f32 %v1693_v52, %v1621_v22 }
  0x98   : > { %485 = vrot.lane.b32.xlu1 %v390_v26, %s1463_s19 }
  0x99   : > { %v1123_v61 = vpack.i.bf16 %v389_v57, %v388_v56 }
  0x9d   : > { %v1637_v29 = vpop.permute.xlu2 %345 }
  0x9e   : > { %v354_v1 = vmul.f32 %v1637_v29, %v1621_v22 }
  0xa3   : > { %v1633_v27 = vpop.permute.xlu0 %413 }
  0xa4   : > { %v1635_v28 = vpop.permute.xlu1 %396  ;;  %v422_v45 = vmul.f32 %v1633_v27, %v1618_v21 }
  0xa5   : > { %v405_v35 = vmul.f32 %v1635_v28, %v1618_v21  ;;  %v1657_v38 = vpop.permute.xlu2 %330 }
  0xa6   : > { %v339_v39 = vmul.f32 %v1657_v38, %v1621_v22 }
  0xab   : > { %v1639_v30 = vpop.permute.xlu0 %415 }
  0xac   : > { %v1641_v31 = vpop.permute.xlu1 %398  ;;  %v424_v32 = vmul.f32 %v1639_v30, %v1618_v21  ;;  %v1671_v43 = vsel %vm417_vm1, %v1633_v27, %v1639_v30 }
  0xad   : > { %v1647_v33 = vsel %vm400_vm0, %v1635_v28, %v1641_v31  ;;  %v407_v34 = vmul.f32 %v1641_v31, %v1618_v21  ;;  %v423_v44 = vmul.f32 %v1671_v43, %v1621_v22 }
  0xae   : > { %v406_v36 = vmul.f32 %v1647_v33, %v1621_v22  ;;  %509 = vrot.lane.b32.xlu0 %v424_v32, %s1464_s26 }
  0xaf   : > { %497 = vrot.lane.b32.xlu2 %v407_v34, %s1465_s27  ;;  %v1113_v51 = vpack.i.bf16 %v423_v44, %v422_v45 }
  0xb0   : > { %v1118_v37 = vpack.i.bf16 %v406_v36, %v405_v35 }
  0xb2   : > { %1119 = vrot.lane.b32.xlu1 %v1118_v37, %s1465_s27 }
  0xb3   : > { %v1664_v41 = vpop.permute.xlu0 %362 }
  0xb4   : > { %v1662_v40 = vpop.permute.xlu1 %364  ;;  %v371_v58 = vmul.f32 %v1664_v41, %v1618_v21 }
  0xb5   : > { %v373_v42 = vmul.f32 %v1662_v40, %v1618_v21  ;;  %v1697_v53 = vsel %vm366_vm4, %v1664_v41, %v1662_v40 }
  0xb6   : > { %v372_v59 = vmul.f32 %v1697_v53, %v1621_v22 }
  0xb7   : > { %443 = vrot.lane.b32.xlu2 %v339_v39, %s1466_s20  ;;  %473 = vrot.lane.b32.xlu0 %v373_v42, %s1467_s12 }
  0xb8   : > { %v1128_v62 = vpack.i.bf16 %v372_v59, %v371_v58 }
  0xbb   : > { %v1679_v46 = vpop.permute.xlu0 %347 }
  0xbc   : > { %v1681_v47 = vpop.permute.xlu1 %328  ;;  %v356_v48 = vmul.f32 %v1679_v46, %v1621_v22  ;;  %v1715_v63 = vsel %vm349_vm5, %v1637_v29, %v1679_v46 }
  0xbd   : > { %v1687_v49 = vsel %vm332_vm2, %v1681_v47, %v1657_v38  ;;  %v337_v50 = vmul.f32 %v1681_v47, %v1621_v22  ;;  %v355_v2 = vmul.f32 %v1715_v63, %v1618_v21 }
  0xbe   : > { %v338_v54 = vmul.f32 %v1687_v49, %v1618_v21 }
  0xbf   : > { %1114 = vrot.lane.b32.xlu2 %v1113_v51, %s1464_s26  ;;  %455 = vrot.lane.b32.xlu0 %v356_v48, %s1461_s13  ;;  %v1133_v7 = vpack.i.bf16 %v355_v2, %v354_v1 }
  0xc0   : > { %v1138_v55 = vpack.i.bf16 %v338_v54, %v337_v50 }
  0xc2   : > { %1139 = vrot.lane.b32.xlu1 %v1138_v55, %s1466_s20 }
  0xc3   : > { %v1725_v4 = vpop.permute.xlu0 %311 }
  0xc4   : > { %v1723_v3 = vpop.permute.xlu1 %313  ;;  %v320_v8 = vmul.f32 %v1725_v4, %v1621_v22 }
  0xc5   : > { %v1731_v6 = vsel %vm315_vm6, %v1725_v4, %v1723_v3  ;;  %v322_v10 = vmul.f32 %v1723_v3, %v1621_v22 }
  0xc6   : > { %v321_v9 = vmul.f32 %v1731_v6, %v1618_v21 }
  0xc7   : > { %1124 = vrot.lane.b32.xlu0 %v1123_v61, %s1463_s19  ;;  %1129 = vrot.lane.b32.xlu2 %v1128_v62, %s1467_s12 }
  0xc8   : > { %v1143_v11 = vpack.i.bf16 %v321_v9, %v320_v8 }
  0xca   : > { %296 = vrot.lane.b32.xlu1 %v293_v0, %s1462_s25 }
  0xcc   : > { %v1743_v12 = vpop.permute.xlu1 %1109 }
  0xcd   : > { %v1112_v13 = vunpack.i.h.bf16 %v1743_v12  ;;  %v1111_v14 = vunpack.i.l.bf16 %v1743_v12 }
  0xcf   : > { %294 = vrot.lane.b32.xlu0 %v292_v5, %s1462_s25  ;;  %1134 = vrot.lane.b32.xlu2 %v1133_v7, %s1461_s13  ;;  %v465_v15 = vsel %vm298_vm7, %v1111_v14, %v1112_v13 }
  0xd0   : > { %v1148_v16 = vpack.i.bf16 %v465_v15, %v1111_v14 }
  0xd2   : > { %1149 = vrot.lane.b32.xlu1 %v1148_v16, %s1455_s29 }
  0xd7   : > { %432 = vrot.lane.b32.xlu0 %v322_v10, %s1459_s9  ;;  %1144 = vrot.lane.b32.xlu2 %v1143_v11, %s1459_s9 }
 0x109   : > { %v498_v17 = vpop.permute.xlu2 %497 }
 0x10a   : > { %v486_v26 = vpop.permute.xlu1 %485 }
 0x111   : > { %v1751_v18 = vpop.permute.xlu2 %443 }
 0x119   : > { %v1115_v19 = vpop.permute.xlu2 %1114 }
 0x11a   : > { %v1117_v20 = vunpack.i.h.bf16 %v1115_v19  ;;  %v1116_v23 = vunpack.i.l.bf16 %v1115_v19 }
 0x11c   : > { %v512_v32 = vsel %vm511_vm8, %v1116_v23, %v1117_v20 }
 0x11d   : > { %v1153_v34 = vpack.i.bf16 %v512_v32, %v1116_v23 }
 0x11f   : > { %1154 = vrot.lane.b32.xlu1 %v1153_v34, %s1455_s29 }
 0x120   : > { %v510_v35 = vpop.permute.xlu0 %509 }
 0x121   : > { %v513_v42 = vsel %vm511_vm8, %v1117_v20, %v510_v35  ;;  %v1130_v44 = vpop.permute.xlu2 %1129 }
 0x122   : > { %v1132_v55 = vunpack.i.h.bf16 %v1130_v44  ;;  %v1131_v56 = vunpack.i.l.bf16 %v1130_v44 }
 0x124   : > { %v1120_v36 = vpop.permute.xlu1 %1119  ;;  %v476_v58 = vsel %vm475_vm10, %v1131_v56, %v1132_v55 }
 0x125   : > { %v1122_v37 = vunpack.i.h.bf16 %v1120_v36  ;;  %v1121_v39 = vunpack.i.l.bf16 %v1120_v36 }
 0x127   : > { %v1158_v45 = vpack.i.bf16 %v1121_v39, %v513_v42  ;;  %v500_v48 = vsel %vm499_vm9, %v1121_v39, %v1122_v37  ;;  %v501_v50 = vsel %vm499_vm9, %v1122_v37, %v498_v17 }
 0x128   : > { %v1163_v51 = vpack.i.bf16 %v501_v50, %v500_v48 }
 0x129   : > { %v474_v54 = vpop.permute.xlu0 %473  ;;  %1159 = vrot.lane.b32.xlu2 %v1158_v45, %s1455_s29  ;;  %v1135_v60 = vpop.permute.xlu2 %1134 }
 0x12a   : > { %1164 = vrot.lane.b32.xlu0 %v1163_v51, %s1455_s29  ;;  %v477_v57 = vsel %vm475_vm10, %v1132_v55, %v474_v54  ;;  %v1137_v62 = vunpack.i.h.bf16 %v1135_v60  ;;  %v1136_v15 = vunpack.i.l.bf16 %v1135_v60 }
 0x12b   : > { %v1178_v59 = vpack.i.bf16 %v477_v57, %v476_v58 }
 0x12c   : > { %v457_v32 = vsel %vm315_vm6, %v1136_v15, %v1137_v62 }
 0x12d   : > { %v1183_v36 = vpack.i.bf16 %v457_v32, %v1112_v13 }
 0x131   : > { %v456_v61 = vpop.permute.xlu0 %455 }
 0x132   : > { %1179 = vrot.lane.b32.xlu0 %v1178_v59, %s1455_s29  ;;  %v458_v0 = vsel %vm315_vm6, %v1137_v62, %v456_v61 }
 0x133   : > { %v1188_v1 = vpack.i.bf16 %v456_v61, %v458_v0 }
 0x134   : > { %v1140_v8 = vpop.permute.xlu1 %1139 }
 0x135   : > { %v1142_v16 = vunpack.i.h.bf16 %v1140_v8  ;;  %v1141_v17 = vunpack.i.l.bf16 %v1140_v8 }
 0x137   : > { %v446_v20 = vsel %vm445_vm12, %v1141_v17, %v1142_v16  ;;  %v447_v23 = vsel %vm445_vm12, %v1142_v16, %v1751_v18 }
 0x138   : > { %v1193_v35 = vpack.i.bf16 %v447_v23, %v446_v20 }
 0x139   : > { %v1125_v2 = vpop.permute.xlu0 %1124 }
 0x13a   : > { %v1127_v5 = vunpack.i.h.bf16 %v1125_v2  ;;  %v1126_v7 = vunpack.i.l.bf16 %v1125_v2  ;;  %1189 = vrot.lane.b32.xlu0 %v1188_v1, %s1455_s29 }
 0x13c   : > { %v488_v9 = vsel %vm487_vm11, %v1126_v7, %v1127_v5  ;;  %v489_v10 = vsel %vm487_vm11, %v1127_v5, %v486_v26  ;;  %v1145_v26 = vpop.permute.xlu2 %1144  ;;  %v1775_v34 = vpop.permute.xlu1 %296 }
 0x13d   : > { %v1168_v11 = vpack.i.bf16 %v488_v9, %v1126_v7  ;;  %v1173_v14 = vpack.i.bf16 %v1131_v56, %v489_v10  ;;  %v1147_v37 = vunpack.i.h.bf16 %v1145_v26  ;;  %v1146_v39 = vunpack.i.l.bf16 %v1145_v26  ;;  %v514_v10 = vld [vmem:[%s1983_s3] sm:$0xff] }
 0x13e   : > { %v305_v55 = vmul.f32 %v1775_v34, %v1621_v22 }
 0x13f   : > { %1169 = vrot.lane.b32.xlu1 %v1168_v11, %s1455_s29  ;;  %1174 = vrot.lane.b32.xlu2 %v1173_v14, %s1455_s29  ;;  %v434_v13 = vsel %vm349_vm5, %v1146_v39, %v1147_v37  ;;  %v1468_v11 = vmov 0  }
 0x140   : > { %v1198_v54 = vpack.i.bf16 %v434_v13, %v1751_v18  ;;  %1213 = vset.pattern.permute.xlu0 %v1468_v11  ;;  %1319 = vset.pattern.permute.xlu1 %v1468_v11 }
 0x141   : > { %v1769_v19 = vpop.permute.xlu0 %294 }
 0x142   : > { %v1782_v42 = vsel %vm298_vm7, %v1769_v19, %v1775_v34  ;;  %v303_v44 = vmul.f32 %v1769_v19, %v1621_v22 }
 0x143   : > { %v304_v45 = vmul.f32 %v1782_v42, %v1618_v21 }
 0x144   : > { %v1150_v56 = vpop.permute.xlu1 %1149 }
 0x145   : > { %v1208_v51 = vpack.i.bf16 %v304_v45, %v303_v44 }
 0x147   : > { %1194 = vrot.lane.b32.xlu1 %v1193_v35, %s1455_s29  ;;  %1184 = vrot.lane.b32.xlu2 %v1183_v36, %s1455_s29  ;;  %v1152_v35 = vunpack.i.h.bf16 %v1150_v56  ;;  %v1151_v36 = vunpack.i.l.bf16 %v1150_v56 }
 0x149   : > { %v433_v48 = vpop.permute.xlu0 %432  ;;  %v585_v56 = vsel %vm417_vm1, %v1151_v36, %v1152_v35 }
 0x14a   : > { %v435_v12 = vsel %vm349_vm5, %v1147_v37, %v433_v48 }
 0x14b   : > { %v1203_v50 = vpack.i.bf16 %v433_v48, %v435_v12 }
 0x14d   : > { %1204 = vrot.lane.b32.xlu0 %v1203_v50, %s1455_s29 }
 0x14f   : > { %1209 = vrot.lane.b32.xlu1 %v1208_v51, %s1455_s29  ;;  %1199 = vrot.lane.b32.xlu2 %v1198_v54, %s1455_s29 }
 0x155   : > { %517 = vperm.xlu0 %1213, %v514_v10  }
 0x157   : > { %527 = vrot.lane.b32.xlu2 %v305_v55, %s1455_s29 }
 0x183   : > { %v1160_v57 = vpop.permute.xlu2 %1159 }
 0x184   : > { %v1161_v59 = vunpack.i.l.bf16 %v1160_v57  ;;  %v1162_v1 = vunpack.i.h.bf16 %v1160_v57 }
 0x191   : > { %v1155_v58 = vpop.permute.xlu1 %1154 }
 0x192   : > { %v1157_v60 = vunpack.i.h.bf16 %v1155_v58  ;;  %v1156_v61 = vunpack.i.l.bf16 %v1155_v58 }
 0x194   : > { %v593_v62 = vsel %vm417_vm1, %v1156_v61, %v1157_v60  ;;  %v594_v0 = vsel %vm417_vm1, %v1157_v60, %v1161_v59 }
 0x195   : > { %624 = vmatpush.msra.mxu0 %v593_v62  ;;  %644 = vmatpush.msra.mxu1 %v594_v0 }
 0x199   : > { %v1175_v9 = vpop.permute.xlu2 %1174 }
 0x19a   : > { %v1176_v16 = vunpack.i.l.bf16 %v1175_v9  ;;  %v1177_v39 = vunpack.i.h.bf16 %v1175_v9 }
 0x19c   : > { %v1165_v18 = vpop.permute.xlu0 %1164 }
 0x19d   : > { %v1167_v2 = vunpack.i.h.bf16 %v1165_v18  ;;  %v1166_v5 = vunpack.i.l.bf16 %v1165_v18 }
 0x19f   : > { %v591_v7 = vsel %vm417_vm1, %v1162_v1, %v1166_v5  ;;  %v592_v8 = vsel %vm417_vm1, %v1166_v5, %v1167_v2 }
 0x1a0   : > { %625 = vmatpush.msra.mxu0 %v591_v7  ;;  %645 = vmatpush.msra.mxu1 %v592_v8 }
 0x1a1   : > { %v1185_v15 = vpop.permute.xlu2 %1184 }
 0x1a2   : > { %v1186_v44 = vunpack.i.l.bf16 %v1185_v15  ;;  %v1187_v55 = vunpack.i.h.bf16 %v1185_v15 }
 0x1a4   : > { %v1180_v14 = vpop.permute.xlu0 %1179  ;;  %v586_v57 = vsel %vm417_vm1, %v1152_v35, %v1186_v44 }
 0x1a5   : > { %v1182_v20 = vunpack.i.h.bf16 %v1180_v14  ;;  %v1181_v23 = vunpack.i.l.bf16 %v1180_v14 }
 0x1a7   : > { %v587_v51 = vsel %vm417_vm1, %v1177_v39, %v1181_v23  ;;  %v588_v54 = vsel %vm417_vm1, %v1181_v23, %v1182_v20 }
 0x1a9   : > { %v1200_v12 = vpop.permute.xlu2 %1199 }
 0x1aa   : > { %v1201_v58 = vunpack.i.l.bf16 %v1200_v12  ;;  %v1202_v5 = vunpack.i.h.bf16 %v1200_v12 }
 0x1ac   : > { %v1190_v37 = vpop.permute.xlu0 %1189 }
 0x1ad   : > { %v1192_v13 = vunpack.i.h.bf16 %v1190_v37  ;;  %v1191_v50 = vunpack.i.l.bf16 %v1190_v37 }
 0x1af   : > { %v583_v62 = vsel %vm417_vm1, %v1187_v55, %v1191_v50  ;;  %v584_v0 = vsel %vm417_vm1, %v1191_v50, %v1192_v13 }
 0x1b1   : > { %v1170_v17 = vpop.permute.xlu1 %1169 }
 0x1b2   : > { %v1172_v32 = vunpack.i.h.bf16 %v1170_v17  ;;  %v1171_v26 = vunpack.i.l.bf16 %v1170_v17  ;;  %v289_v17 = vld [vmem:[%s1982_s2] sm:$0xff] }
 0x1b4   : > { %v589_v45 = vsel %vm417_vm1, %v1171_v26, %v1172_v32  ;;  %v590_v48 = vsel %vm417_vm1, %v1172_v32, %v1176_v16  ;;  %v528_v16 = vpop.permute.xlu2 %527 }
 0x1b5   : > { %626 = vmatpush.msra.mxu0 %v589_v45  ;;  %646 = vmatpush.msra.mxu1 %v590_v48 }
 0x1b7   : > { %627 = vmatpush.msra.mxu0 %v587_v51  ;;  %647 = vmatpush.msra.mxu1 %v588_v54 }
 0x1b9   : > { %v1195_v59 = vpop.permute.xlu1 %1194  ;;  %628 = vmatpush.msra.mxu0 %v585_v56  ;;  %648 = vmatpush.msra.mxu1 %v586_v57 }
 0x1ba   : > { %v1197_v60 = vunpack.i.h.bf16 %v1195_v59  ;;  %v1196_v61 = vunpack.i.l.bf16 %v1195_v59 }
 0x1bb   : > { %629 = vmatpush.msra.mxu0 %v583_v62  ;;  %649 = vmatpush.msra.mxu1 %v584_v0 }
 0x1bc   : > { %v581_v18 = vsel %vm417_vm1, %v1196_v61, %v1197_v60  ;;  %v582_v1 = vsel %vm417_vm1, %v1197_v60, %v1201_v58 }
 0x1bd   : > { %630 = vmatpush.msra.mxu0 %v581_v18  ;;  %650 = vmatpush.msra.mxu1 %v582_v1 }
 0x1bf   : > { %v1205_v2 = vpop.permute.xlu0 %1204 }
 0x1c0   : > { %v1207_v7 = vunpack.i.h.bf16 %v1205_v2  ;;  %v1206_v8 = vunpack.i.l.bf16 %v1205_v2 }
 0x1c1   : > { %v1210_v9 = vpop.permute.xlu1 %1209 }
 0x1c2   : > { %v1212_v10 = vunpack.i.h.bf16 %v1210_v9  ;;  %v1211_v11 = vunpack.i.l.bf16 %v1210_v9  ;;  %v579_v14 = vsel %vm417_vm1, %v1202_v5, %v1206_v8  ;;  %v580_v15 = vsel %vm417_vm1, %v1206_v8, %v1207_v7 }
 0x1c3   : > { %631 = vmatpush.msra.mxu0 %v579_v14  ;;  %651 = vmatpush.msra.mxu1 %v580_v15 }
 0x1c4   : > { %v577_v20 = vsel %vm417_vm1, %v1211_v11, %v1212_v10  ;;  %v578_v23 = vsel %vm417_vm1, %v1212_v10, %v528_v16 }
 0x1c5   : > { %632 = vmatpush.msra.mxu0 %v577_v20  ;;  %652 = vmatpush.msra.mxu1 %v578_v23 }
 0x1c6   : > { %1024 = vmatmul.msk.f32.vlgmr.msra.gmra.mxu0 %vm613_vm13, %v289_v17  ;;  %1025 = vmatmul.msk.f32.vlgmr.msra.gmra.mxu1 %vm613_vm13, %v289_v17 }
 0x1c7   : > { %v518_v32 = vpop.permute.xlu0 %517 }
 0x243   : > { %v634_v26 = vpop.f32.mrf.mxu0  ;;  %v654_v35 = vpop.f32.mrf.mxu1 }
 0x244   : > { %v635_v36 = vadd.f32 %v634_v26, %v518_v32  ;;  %v655_v37 = vadd.f32 %v654_v35, %v518_v32 }
 0x246   : > { %v657_v39 = vmax.f32 %v635_v36, 0.0  ;;  %v1825_v44 = vmax.f32 %v655_v37, 0.0 }
 0x248   : > { %v683_v45 = vmul.f32 %v657_v39, %v1639_v30  ;;  %v1214_v48 = vpack.i.bf16 %v1825_v44, %v657_v39  ;;  %v675_v12 = vmul.f32 %v657_v39, %v1626_v24  ;;  %v676_v13 = vmul.f32 %v1825_v44, %v1693_v52 }
 0x249   : > { %v681_v51 = vmul.f32 %v657_v39, %v1633_v27  ;;  %v682_v54 = vmul.f32 %v1825_v44, %v1671_v43  ;;  %v1840_v30 = vmul.f32 %v1825_v44, %v1769_v19  ;;  %v1843_v24 = vmul.f32 %v657_v39, %v1782_v42 }
 0x24a   : > { %764 = vrot.lane.b32.xlu2 %v683_v45, %s1464_s26  ;;  %1215 = vrot.lane.b32.xlu1 %v1214_v48, %s1462_s25  ;;  %v1229_v50 = vpack.i.bf16 %v676_v13, %v675_v12  ;;  %v680_v52 = vmul.f32 %v657_v39, %v1641_v31  ;;  %v674_v27 = vmul.f32 %v657_v39, %v1662_v40 }
 0x24b   : > { %v1219_v55 = vpack.i.bf16 %v682_v54, %v681_v51  ;;  %v1314_v56 = vpack.i.bf16 %v1843_v24, %v1840_v30  ;;  %v678_v43 = vmul.f32 %v657_v39, %v1635_v28  ;;  %v679_v19 = vmul.f32 %v1825_v44, %v1647_v33 }
 0x24c   : > { %1230 = vrot.lane.b32.xlu0 %v1229_v50, %s1463_s19  ;;  %v672_v42 = vmul.f32 %v657_v39, %v1664_v41  ;;  %v673_v31 = vmul.f32 %v1825_v44, %v1697_v53  ;;  %v671_v40 = vmul.f32 %v1825_v44, %v1679_v46  ;;  %v669_v28 = vmul.f32 %v1825_v44, %v1637_v29 }
 0x24d   : > { %v1224_v57 = vpack.i.bf16 %v679_v19, %v678_v43  ;;  %v670_v33 = vmul.f32 %v657_v39, %v1715_v63  ;;  %v663_v41 = vmul.f32 %v1825_v44, %v1725_v4  ;;  %v664_v53 = vmul.f32 %v657_v39, %v1731_v6 }
 0x24e   : > { %v1234_v58 = vpack.i.bf16 %v673_v31, %v672_v42  ;;  %v677_v59 = vmul.f32 %v657_v39, %v1628_v25  ;;  %v666_v29 = vmul.f32 %v1825_v44, %v1681_v47  ;;  %v667_v63 = vmul.f32 %v657_v39, %v1687_v49 }
 0x24f   : > { %v1239_v60 = vpack.i.bf16 %v670_v33, %v669_v28  ;;  %v1249_v46 = vpack.i.bf16 %v664_v53, %v663_v41  ;;  %v668_v4 = vmul.f32 %v1825_v44, %v1657_v38  ;;  %v665_v25 = vmul.f32 %v1825_v44, %v1723_v3 }
 0x250   : > { %v1244_v61 = vpack.i.bf16 %v667_v63, %v666_v29 }
 0x252   : > { %753 = vrot.lane.b32.xlu2 %v680_v52, %s1465_s27  ;;  %1220 = vrot.lane.b32.xlu1 %v1219_v55, %s1464_s26 }
 0x254   : > { %731 = vrot.lane.b32.xlu0 %v674_v27, %s1467_s12 }
 0x25a   : > { %1225 = vrot.lane.b32.xlu1 %v1224_v57, %s1465_s27  ;;  %1235 = vrot.lane.b32.xlu2 %v1234_v58, %s1467_s12  ;;  %s286_s12 = scalar_lea.vmem [#allocation7], %s1021_s7  ;;  %s1400_s7 = scalar_lea.hbm %s1986_s6, 32 }
 0x25b   : > { %s930_s30 = sshll.u32 %s286_s12, 4  ;;  %s931_s30 = int_to_ptr.vmem [resolvable:$true] %s930_s30 }
 0x25c   : > { %713 = vrot.lane.b32.xlu0 %v671_v40, %s1461_s13 }
 0x262   : > { %742 = vrot.lane.b32.xlu1 %v677_v59, %s1463_s19  ;;  %1240 = vrot.lane.b32.xlu2 %v1239_v60, %s1461_s13  ;;  %s1034_s19 = sshll.u32 %s1528_s28, 4  ;;  %s917_s28 = scalar_lea.sflag [#allocation4], %s1595_s17 }
 0x264   : > { %1250 = vrot.lane.b32.xlu0 %v1249_v46, %s1459_s9 }
 0x26a   : > { %702 = vrot.lane.b32.xlu2 %v668_v4, %s1466_s20  ;;  %1245 = vrot.lane.b32.xlu1 %v1244_v61, %s1466_s20  ;;  %s928_s20 = scalar_lea.hbm %s1986_s6, %s1034_s19 }
 0x26b   : > { %s932_s8 = sshll.u32 %s928_s20, 4  ;;  %s933_s8 = int_to_ptr.hbm [resolvable:$true] %s932_s8 }
 0x26c   : > { %s1394_s15 = sshra.s32 %s933_s8, 4  ;;  %s1395_s15 = int_to_ptr.hbm [resolvable:$true] %s1394_s15 }
 0x26d   : > { %s1396_s10 = scalar_lea.hbm %s1395_s15, 16  ;;  %p1401_p12 = scmp.lt.s32.totalorder %s1395_s15, %s1986_s6 }
 0x26e   : > { %p1397_p1 = scmp.ne.s32.totalorder %s1395_s15, %s1396_s10  ;;  %p1402_p8 = scmp.lt.s32.totalorder %s1400_s7, %s1396_s10 }
 0x270   : > { %p1398_p3 = pnand %p1397_p1, %p1564_p13  ;;  %p1403_p7 = por %p1402_p8, %p1401_p12 }
 0x272   : > { %691 = vrot.lane.b32.xlu1 %v665_v25, %s1459_s9  ;;  %p1399_p5 = pneg %p1398_p3 }
 0x274   : > { %p1404_p9 = pnand %p1403_p7, %p1399_p5 }
 0x2a4   : > { %v765_v6 = vpop.permute.xlu2 %764 }
 0x2ac   : > { %v754_v1 = vpop.permute.xlu2 %753 }
 0x2b4   : > { %v1236_v14 = vpop.permute.xlu2 %1235 }
 0x2b5   : > { %v1238_v39 = vunpack.i.h.bf16 %v1236_v14  ;;  %v1237_v45 = vunpack.i.l.bf16 %v1236_v14 }
 0x2b7   : > { %v733_v52 = vsel %vm475_vm10, %v1237_v45, %v1238_v39 }
 0x2bc   : > { %v1216_v62 = vpop.permute.xlu1 %1215  ;;  %v1241_v12 = vpop.permute.xlu2 %1240 }
 0x2bd   : > { %v1218_v0 = vunpack.i.h.bf16 %v1216_v62  ;;  %v1217_v18 = vunpack.i.l.bf16 %v1216_v62  ;;  %v1243_v55 = vunpack.i.h.bf16 %v1241_v12  ;;  %v1242_v27 = vunpack.i.l.bf16 %v1241_v12 }
 0x2be   : > { %v1231_v49 = vpop.permute.xlu0 %1230  ;;  %v662_v62 = vmul.f32 %v1825_v44, %v1775_v34  ;;  %v768_v44 = vld [vmem:[%s1985_s5] sm:$0xff] }
 0x2bf   : > { %v723_v47 = vsel %vm298_vm7, %v1217_v18, %v1218_v0  ;;  %v1233_v3 = vunpack.i.h.bf16 %v1231_v49  ;;  %v1232_v10 = vunpack.i.l.bf16 %v1231_v49  ;;  %v715_v42 = vsel %vm315_vm6, %v1242_v27, %v1243_v55 }
 0x2c0   : > { %v1254_v2 = vpack.i.bf16 %v723_v47, %v1217_v18  ;;  %v1289_v33 = vpack.i.bf16 %v715_v42, %v1218_v0 }
 0x2c1   : > { %v744_v16 = vsel %vm487_vm11, %v1232_v10, %v1233_v3 }
 0x2c2   : > { %1255 = vrot.lane.b32.xlu2 %v1254_v2, %s1455_s29  ;;  %v1274_v36 = vpack.i.bf16 %v744_v16, %v1232_v10 }
 0x2c4   : > { %v1221_v38 = vpop.permute.xlu1 %1220  ;;  %v703_v28 = vpop.permute.xlu2 %702 }
 0x2c5   : > { %v1223_v5 = vunpack.i.h.bf16 %v1221_v38  ;;  %v1222_v7 = vunpack.i.l.bf16 %v1221_v38 }
 0x2c6   : > { %v732_v11 = vpop.permute.xlu0 %731 }
 0x2c7   : > { %v766_v8 = vsel %vm511_vm8, %v1222_v7, %v1223_v5  ;;  %v767_v23 = vsel %vm511_vm8, %v1223_v5, %v765_v6  ;;  %v734_v50 = vsel %vm475_vm10, %v1238_v39, %v732_v11 }
 0x2c8   : > { %v1259_v9 = vpack.i.bf16 %v766_v8, %v1222_v7  ;;  %v1284_v43 = vpack.i.bf16 %v734_v50, %v733_v52 }
 0x2ca   : > { %1260 = vrot.lane.b32.xlu2 %v1259_v9, %s1455_s29 }
 0x2cc   : > { %v1226_v15 = vpop.permute.xlu1 %1225 }
 0x2cd   : > { %v1228_v17 = vunpack.i.h.bf16 %v1226_v15  ;;  %v1227_v20 = vunpack.i.l.bf16 %v1226_v15 }
 0x2ce   : > { %v714_v48 = vpop.permute.xlu0 %713 }
 0x2cf   : > { %v1264_v32 = vpack.i.bf16 %v1227_v20, %v767_v23  ;;  %v755_v26 = vsel %vm499_vm9, %v1227_v20, %v1228_v17  ;;  %v756_v35 = vsel %vm499_vm9, %v1228_v17, %v754_v1  ;;  %v716_v31 = vsel %vm315_vm6, %v1243_v55, %v714_v48 }
 0x2d0   : > { %v1269_v37 = vpack.i.bf16 %v756_v35, %v755_v26  ;;  %v1294_v59 = vpack.i.bf16 %v714_v48, %v716_v31 }
 0x2d1   : > { %1265 = vrot.lane.b32.xlu0 %v1264_v32, %s1455_s29 }
 0x2d2   : > { %1275 = vrot.lane.b32.xlu2 %v1274_v36, %s1455_s29  ;;  %1270 = vrot.lane.b32.xlu1 %v1269_v37, %s1455_s29 }
 0x2d4   : > { %v743_v13 = vpop.permute.xlu1 %742 }
 0x2d5   : > { %v745_v51 = vsel %vm487_vm11, %v1233_v3, %v743_v13 }
 0x2d6   : > { %v1279_v54 = vpack.i.bf16 %v1237_v45, %v745_v51  ;;  %v1251_v57 = vpop.permute.xlu0 %1250 }
 0x2d7   : > { %v1253_v60 = vunpack.i.h.bf16 %v1251_v57  ;;  %v1252_v46 = vunpack.i.l.bf16 %v1251_v57 }
 0x2d9   : > { %1280 = vrot.lane.b32.xlu0 %v1279_v54, %s1455_s29  ;;  %v693_v4 = vsel %vm349_vm5, %v1252_v46, %v1253_v60 }
 0x2da   : > { %1285 = vrot.lane.b32.xlu1 %v1284_v43, %s1455_s29  ;;  %v1304_v25 = vpack.i.bf16 %v693_v4, %v703_v28 }
 0x2dc   : > { %v1246_v19 = vpop.permute.xlu1 %1245 }
 0x2dd   : > { %v1248_v58 = vunpack.i.h.bf16 %v1246_v19  ;;  %v1247_v40 = vunpack.i.l.bf16 %v1246_v19 }
 0x2df   : > { %v704_v41 = vsel %vm445_vm12, %v1247_v40, %v1248_v58  ;;  %v705_v53 = vsel %vm445_vm12, %v1248_v58, %v703_v28 }
 0x2e0   : > { %v1299_v29 = vpack.i.bf16 %v705_v53, %v704_v41 }
 0x2e1   : > { %1290 = vrot.lane.b32.xlu0 %v1289_v33, %s1455_s29 }
 0x2e2   : > { %1300 = vrot.lane.b32.xlu2 %v1299_v29, %s1455_s29  ;;  %1295 = vrot.lane.b32.xlu1 %v1294_v59, %s1455_s29 }
 0x2e4   : > { %v692_v63 = vpop.permute.xlu1 %691 }
 0x2e5   : > { %v694_v61 = vsel %vm349_vm5, %v1253_v60, %v692_v63 }
 0x2e6   : > { %v1309_v6 = vpack.i.bf16 %v692_v63, %v694_v61  ;;  %v659_v63 = vld [vmem:[%s1984_s4] sm:$0xff] }
 0x2e9   : > { %1305 = vrot.lane.b32.xlu0 %v1304_v25, %s1455_s29 }
 0x2ea   : > { %1310 = vrot.lane.b32.xlu1 %v1309_v6, %s1455_s29  ;;  %1315 = vrot.lane.b32.xlu2 %v1314_v56, %s1455_s29 }
 0x2f1   : > { %781 = vrot.lane.b32.xlu0 %v662_v62, %s1455_s29 }
 0x2f2   : > { %771 = vperm.xlu1 %1319, %v768_v44  }
 0x31c   : > { %v1256_v0 = vpop.permute.xlu2 %1255 }
 0x31d   : > { %v1258_v20 = vunpack.i.h.bf16 %v1256_v0  ;;  %v1257_v23 = vunpack.i.l.bf16 %v1256_v0 }
 0x31f   : > { %v839_v45 = vsel %vm417_vm1, %v1257_v23, %v1258_v20 }
 0x324   : > { %v1261_v18 = vpop.permute.xlu2 %1260 }
 0x325   : > { %v1263_v47 = vunpack.i.h.bf16 %v1261_v18  ;;  %v1262_v49 = vunpack.i.l.bf16 %v1261_v18 }
 0x327   : > { %v847_v1 = vsel %vm417_vm1, %v1262_v49, %v1263_v47 }
 0x328   : > { %877 = vmatpush.msra.mxu2 %v847_v1 }
 0x32c   : > { %v1276_v2 = vpop.permute.xlu2 %1275 }
 0x32d   : > { %v1278_v9 = vunpack.i.h.bf16 %v1276_v2  ;;  %v1277_v30 = vunpack.i.l.bf16 %v1276_v2 }
 0x32f   : > { %v843_v11 = vsel %vm417_vm1, %v1277_v30, %v1278_v9 }
 0x33c   : > { %v1301_v39 = vpop.permute.xlu2 %1300 }
 0x33d   : > { %v1303_v51 = vunpack.i.h.bf16 %v1301_v39  ;;  %v1302_v54 = vunpack.i.l.bf16 %v1301_v39 }
 0x33f   : > { %v835_v42 = vsel %vm417_vm1, %v1302_v54, %v1303_v51 }
 0x343   : > { %v1266_v38 = vpop.permute.xlu0 %1265 }
 0x344   : > { %v1268_v5 = vunpack.i.h.bf16 %v1266_v38  ;;  %v1267_v7 = vunpack.i.l.bf16 %v1266_v38  ;;  %v1271_v8 = vpop.permute.xlu1 %1270  ;;  %v1316_v31 = vpop.permute.xlu2 %1315 }
 0x345   : > { %v1273_v24 = vunpack.i.h.bf16 %v1271_v8  ;;  %v1272_v56 = vunpack.i.l.bf16 %v1271_v8  ;;  %v1318_v33 = vunpack.i.h.bf16 %v1316_v31  ;;  %v1317_v41 = vunpack.i.l.bf16 %v1316_v31 }
 0x346   : > { %v848_v34 = vsel %vm417_vm1, %v1263_v47, %v1267_v7 }
 0x347   : > { %897 = vmatpush.msra.mxu3 %v848_v34  ;;  %v845_v3 = vsel %vm417_vm1, %v1268_v5, %v1272_v56  ;;  %v846_v10 = vsel %vm417_vm1, %v1272_v56, %v1273_v24  ;;  %v831_v4 = vsel %vm417_vm1, %v1317_v41, %v1318_v33 }
 0x348   : > { %878 = vmatpush.msra.mxu2 %v845_v3 }
 0x349   : > { %898 = vmatpush.msra.mxu3 %v846_v10 }
 0x34a   : > { %879 = vmatpush.msra.mxu2 %v843_v11 }
 0x34b   : > { %v1281_v14 = vpop.permute.xlu0 %1280 }
 0x34c   : > { %v1283_v15 = vunpack.i.h.bf16 %v1281_v14  ;;  %v1282_v16 = vunpack.i.l.bf16 %v1281_v14  ;;  %v1286_v17 = vpop.permute.xlu1 %1285 }
 0x34d   : > { %v1288_v32 = vunpack.i.h.bf16 %v1286_v17  ;;  %v1287_v26 = vunpack.i.l.bf16 %v1286_v17 }
 0x34e   : > { %v844_v35 = vsel %vm417_vm1, %v1278_v9, %v1282_v16 }
 0x34f   : > { %899 = vmatpush.msra.mxu3 %v844_v35  ;;  %v841_v36 = vsel %vm417_vm1, %v1283_v15, %v1287_v26  ;;  %v842_v37 = vsel %vm417_vm1, %v1287_v26, %v1288_v32 }
 0x350   : > { %880 = vmatpush.msra.mxu2 %v841_v36 }
 0x351   : > { %900 = vmatpush.msra.mxu3 %v842_v37 }
 0x352   : > { %881 = vmatpush.msra.mxu2 %v839_v45 }
 0x353   : > { %v1291_v48 = vpop.permute.xlu0 %1290 }
 0x354   : > { %v1293_v12 = vunpack.i.h.bf16 %v1291_v48  ;;  %v1292_v13 = vunpack.i.l.bf16 %v1291_v48  ;;  %v1296_v50 = vpop.permute.xlu1 %1295 }
 0x355   : > { %v1298_v52 = vunpack.i.h.bf16 %v1296_v50  ;;  %v1297_v55 = vunpack.i.l.bf16 %v1296_v50 }
 0x356   : > { %v840_v27 = vsel %vm417_vm1, %v1258_v20, %v1292_v13 }
 0x357   : > { %901 = vmatpush.msra.mxu3 %v840_v27  ;;  %v837_v43 = vsel %vm417_vm1, %v1293_v12, %v1297_v55  ;;  %v838_v19 = vsel %vm417_vm1, %v1297_v55, %v1298_v52 }
 0x358   : > { %882 = vmatpush.msra.mxu2 %v837_v43 }
 0x359   : > { %902 = vmatpush.msra.mxu3 %v838_v19 }
 0x35a   : > { %883 = vmatpush.msra.mxu2 %v835_v42 }
 0x35b   : > { %v1306_v57 = vpop.permute.xlu0 %1305 }
 0x35c   : > { %v1308_v58 = vunpack.i.h.bf16 %v1306_v57  ;;  %v1307_v40 = vunpack.i.l.bf16 %v1306_v57  ;;  %v1311_v28 = vpop.permute.xlu1 %1310 }
 0x35d   : > { %v1313_v53 = vunpack.i.h.bf16 %v1311_v28  ;;  %v1312_v59 = vunpack.i.l.bf16 %v1311_v28 }
 0x35e   : > { %v836_v60 = vsel %vm417_vm1, %v1303_v51, %v1307_v40 }
 0x35f   : > { %903 = vmatpush.msra.mxu3 %v836_v60  ;;  %v833_v46 = vsel %vm417_vm1, %v1308_v58, %v1312_v59  ;;  %v834_v29 = vsel %vm417_vm1, %v1312_v59, %v1313_v53 }
 0x360   : > { %884 = vmatpush.msra.mxu2 %v833_v46 }
 0x361   : > { %904 = vmatpush.msra.mxu3 %v834_v29 }
 0x362   : > { %885 = vmatpush.msra.mxu2 %v831_v4 }
 0x363   : > { %v782_v61 = vpop.permute.xlu0 %781  ;;  %1026 = vmatmul.msk.f32.vlgmr.msra.gmra.mxu2 %vm613_vm13, %v659_v63 }
 0x364   : > { %v832_v25 = vsel %vm417_vm1, %v1318_v33, %v782_v61  ;;  %v772_v6 = vpop.permute.xlu1 %771 }
 0x365   : > { %905 = vmatpush.msra.mxu3 %v832_v25 }
 0x366   : > { %1027 = vmatmul.msk.f32.vlgmr.msra.gmra.mxu3 %vm613_vm13, %v659_v63 }
 0x3e6   : > { %v887_v62 = vpop.f32.mrf.mxu2 }
 0x3e7   : > { %v888_v0 = vadd.f32 %v887_v62, %v772_v6 }
 0x3e9   : > { %v910_v18 = vadd.f32 %v888_v0, %v1618_v21  ;;  %v907_v47 = vpop.f32.mrf.mxu3 }
 0x3ea   : > { %v908_v49 = vadd.f32 %v907_v47, %v772_v6 }
 0x3eb   : > { %v912_v1 = vmax.f32 %v910_v18, 0.0 }
 0x3ec   : > { %v911_v2 = vadd.f32 %v908_v49, %v1621_v22 }
 0x3ed   : > { %914 = vst [vmem:[%s286_s12] sm:$0xff] %v912_v1 }
 0x3ee   : > { %v913_v38 = vmax.f32 %v911_v2, 0.0 }
 0x3f0   : > { %915 = vst [vmem:[%s286_s12 + $0x8] sm:$0xff] %v913_v38 }
 0x3f1   : > { %1407 = shalt.err (!%p1404_p9)
}
 0x3f2   : > { %1041 = dma.vmem_to_hbm [thread:$0]  (%p1564_p13), %s931_s30, 256, %s933_s8, %s917_s28  }
 0x3f3 PF: > { %s944_s17 = sand.u32 1, %s1438_s21   ;;  %p1992_p10 = scmp.ge.s32.totalorder %s1450_s24, 2 }
 0x3f4   : > { %s945_s19 = scalar_lea.sflag [#allocation4], %s944_s17 }
 0x3f5   : > { %p1052_p11 = pnand %p1992_p10, %p1569_p4 }
 0x3f7   : > { %p1053_p0 = pneg %p1052_p11 }
 0x3f9   : > { %1433 = dma.done.wait (%p1053_p0), %s945_s19, 256  }
 0x3fa   : > { %1435 = vsyncadd (%p1053_p0), %s945_s19, 4294967040  ;;  %p20_p2 = scmp.ge.s32.totalorder %s1544_s11, 4   ;;  %s1993_s21 = smov %s1442_s22 }
 0x3fb   : > { %s1994_s22 = smov %s1446_s23  ;;  %s1995_s23 = smov %s1556_s14 }
 0x3fc   : > { %s1996_s24 = smov %s1544_s11  ;;  %22 = sbr.rel (!%p20_p2) target bundleno = 6 (0x6), region = 100 }
 0x401   :  { %951 = vsyncpa [#allocation3], 1 }
 0x402   :  { %953 = vsyncpa [#allocation3 + $0x1], 1 }
 0x403   :  { %954 = vsyncpa [#allocation6], 1 }
 0x404   :  { %955 = vsyncpa [#allocation4], 1 }
 0x405   :  { %957 = vsyncpa [#allocation4 + $0x1], 1 }

</bundles_post_ra>
